<compile_context>
chip_gen: v7x
topology: tpu7x:2x2x1
jax: 0.10.0
libtpu: 0.0.40
codegen_flags: <defaults>
</compile_context>

<pallas_src>
import jax
import jax.numpy as jnp
from jax.experimental import pallas as pl
from jax.experimental.pallas import tpu as pltpu


# Row indices inside the packed (9, H) bias / LayerNorm-vector tile.
_BQ, _BK, _BV, _BO, _B2, _LN1G, _LN1B, _LN2G, _LN2B = range(9)
_NUM_VEC = 9


def _layer_norm(x, gamma, beta, eps=1e-5):
    mu = jnp.mean(x, axis=-1, keepdims=True)
    var = jnp.mean(jnp.square(x - mu), axis=-1, keepdims=True)
    return (x - mu) * jax.lax.rsqrt(var + eps) * gamma + beta


# ---------------------------------------------------------------------------
# Fused transformer-encoder-layer kernel (one batch *tile* per grid step)
# ---------------------------------------------------------------------------
def encoder_layer_kernel(
    x_ref,        # (Bt, S, H)  f32 embedded tokens
    bias_ref,     # (Bt, 1, S)  f32 additive attention-mask bias
    wq_ref, wk_ref, wv_ref, wo_ref,   # (H, H) bf16
    w1_ref, w2_ref,                   # (H, F), (F, H) bf16
    vec_ref,      # (9, H) f32 packed biases + LayerNorm params
    b1_ref,       # (1, F) f32 FFN bias
    out_ref,      # (Bt, 1, H) f32 -> CLS rows only
):
    Bt, S, H = x_ref.shape
    R = Bt * S
    # Single head => head_dim == H.
    # TODO(synk): switch to head_dim**-0.5 if multi-head attention is added.
    scale = float(H) ** -0.5

    def vec(i):
        return vec_ref[i:i + 1, :]            # (1, H) f32, broadcasts over rows

    x = x_ref[...]                            # (Bt, S, H) f32 residual stream
    x_flat = x.reshape(R, H)
    xb = x_flat.astype(jnp.bfloat16)

    # --- self-attention: projections as (R,H)x(H,H) bf16 MXU matmuls, f32 acc ---
    q = jnp.dot(xb, wq_ref[...], preferred_element_type=jnp.float32) + vec(_BQ)
    k = jnp.dot(xb, wk_ref[...], preferred_element_type=jnp.float32) + vec(_BK)
    v = jnp.dot(xb, wv_ref[...], preferred_element_type=jnp.float32) + vec(_BV)

    q3 = q.reshape(Bt, S, H).astype(jnp.bfloat16)
    k3 = k.reshape(Bt, S, H).astype(jnp.bfloat16)
    v3 = v.reshape(Bt, S, H).astype(jnp.bfloat16)

    # Contract the hidden axis directly (no k.T / XLU transpose).
    scores = jnp.einsum("bqd,bkd->bqk", q3, k3,
                        preferred_element_type=jnp.float32) * scale
    scores = scores + bias_ref[...]                     # mask padded keys
    scores = scores - jnp.max(scores, axis=-1, keepdims=True)
    p = jnp.exp(scores)
    p = p * pl.reciprocal(jnp.sum(p, axis=-1, keepdims=True), approx=True)

    ctx = jnp.einsum("bqk,bkd->bqd", p.astype(jnp.bfloat16), v3,
                     preferred_element_type=jnp.float32)        # (Bt, S, H) f32
    attn = jnp.dot(ctx.reshape(R, H).astype(jnp.bfloat16), wo_ref[...],
                   preferred_element_type=jnp.float32) + vec(_BO)

    h1 = _layer_norm(x_flat + attn, vec(_LN1G), vec(_LN1B))

    # --- feed-forward ---
    ff = jnp.dot(h1.astype(jnp.bfloat16), w1_ref[...],
                 preferred_element_type=jnp.float32) + b1_ref[...]
    # TODO(synk): PyTorch nn.GELU defaults to the exact erf form; tanh approx used here.
    ff = jax.nn.gelu(ff, approximate=True)
    ff = jnp.dot(ff.astype(jnp.bfloat16), w2_ref[...],
                 preferred_element_type=jnp.float32) + vec(_B2)

    h2 = _layer_norm(h1 + ff, vec(_LN2G), vec(_LN2B))

    # Write only the [CLS] (position 0) row of every sequence in this tile.
    out_ref[...] = h2.reshape(Bt, S, H)[:, 0:1, :]


# ---------------------------------------------------------------------------
# Parameter construction (deterministic, synthetic)
# ---------------------------------------------------------------------------
def init_params(key, vocab, max_len, hidden, ffn):
    ks = jax.random.split(key, 8)
    s = 0.02
    return {
        "word_emb": jax.random.normal(ks[0], (vocab, hidden), jnp.float32) * s,
        "pos_emb":  jax.random.normal(ks[1], (max_len, hidden), jnp.float32) * s,
        "wq": jax.random.normal(ks[2], (hidden, hidden), jnp.float32) * s,
        "wk": jax.random.normal(ks[3], (hidden, hidden), jnp.float32) * s,
        "wv": jax.random.normal(ks[4], (hidden, hidden), jnp.float32) * s,
        "wo": jax.random.normal(ks[5], (hidden, hidden), jnp.float32) * s,
        "w1": jax.random.normal(ks[6], (hidden, ffn), jnp.float32) * s,
        "w2": jax.random.normal(ks[7], (ffn, hidden), jnp.float32) * s,
        "bq": jnp.zeros((1, hidden), jnp.float32),
        "bk": jnp.zeros((1, hidden), jnp.float32),
        "bv": jnp.zeros((1, hidden), jnp.float32),
        "bo": jnp.zeros((1, hidden), jnp.float32),
        "b1": jnp.zeros((1, ffn), jnp.float32),
        "b2": jnp.zeros((1, hidden), jnp.float32),
        "ln1g": jnp.ones((1, hidden), jnp.float32),
        "ln1b": jnp.zeros((1, hidden), jnp.float32),
        "ln2g": jnp.ones((1, hidden), jnp.float32),
        "ln2b": jnp.zeros((1, hidden), jnp.float32),
    }


def _choose_batch_tile(B, S, target_rows=256):
    """Smallest divisor of B whose tile has >= target_rows rows, else whole batch."""
    for bt in range(1, B + 1):
        if B % bt == 0 and bt * S >= target_rows:
            return bt
    return B


# ---------------------------------------------------------------------------
# Wrapper: embedding lookup (glue) -> fused Pallas encoder layer -> CLS rows
# ---------------------------------------------------------------------------
def query_encoder_forward(params, input_ids, attention_mask):
    # TODO(synk): the original module calls a text tokenizer; string tokenization
    # has no Pallas equivalent, so input_ids/attention_mask are taken directly.
    B, S = input_ids.shape
    H = params["word_emb"].shape[1]
    F = params["w1"].shape[1]

    # Embedding lookup (glue, plain JAX gather).
    pos = jnp.arange(S)
    x = params["word_emb"][input_ids] + params["pos_emb"][pos][None, :, :]   # (B,S,H) f32

    # Precomputed additive attention-mask bias: 0 for real tokens, -1e9 for padding.
    mask_bias = ((1.0 - attention_mask.astype(jnp.float32)) * (-1e9)).reshape(B, 1, S)

    # bf16 weights: half the HBM->VMEM traffic, native MXU rate; f32 accumulation in-kernel.
    to_bf16 = lambda w: w.astype(jnp.bfloat16)
    wq, wk, wv, wo = map(to_bf16, (params["wq"], params["wk"], params["wv"], params["wo"]))
    w1, w2 = to_bf16(params["w1"]), to_bf16(params["w2"])

    # Pack all (1,H) bias / LayerNorm vectors into a single (9,H) tile (one padded
    # (8,128) VMEM tile + one DMA instead of nine).
    vec_h = jnp.concatenate(
        [params["bq"], params["bk"], params["bv"], params["bo"], params["b2"],
         params["ln1g"], params["ln1b"], params["ln2g"], params["ln2b"]], axis=0)
    b1 = params["b1"]

    Bt = _choose_batch_tile(B, S)
    grid = (B // Bt,)

    def const(shape):
        return pl.BlockSpec(shape, lambda b, _s=shape: tuple(0 for _ in _s))

    cls = pl.pallas_call(
        encoder_layer_kernel,
        out_shape=jax.ShapeDtypeStruct((B, 1, H), jnp.float32),
        grid=grid,
        in_specs=[
            pl.BlockSpec((Bt, S, H), lambda b: (b, 0, 0)),   # x
            pl.BlockSpec((Bt, 1, S), lambda b: (b, 0, 0)),   # mask bias
            const((H, H)), const((H, H)), const((H, H)), const((H, H)),   # wq wk wv wo
            const((H, F)), const((F, H)),                                  # w1 w2
            const((_NUM_VEC, H)),                                          # packed vectors
            const((1, F)),                                                 # b1
        ],
        out_specs=pl.BlockSpec((Bt, 1, H), lambda b: (b, 0, 0)),
        compiler_params=pltpu.CompilerParams(
            dimension_semantics=("parallel",),          # batch-tile axis -> both TCs on v7x
            vmem_limit_bytes=64 * 1024 * 1024,
        ),
    )(x, mask_bias, wq, wk, wv, wo, w1, w2, vec_h, b1)

    # Kernel already emitted only the CLS rows; (B,1,H) -> (B,H) is a free reshape.
    return cls.reshape(B, H)


# ---------------------------------------------------------------------------
if __name__ == "__main__":
    B, S, H, F, VOCAB, MAX_LEN = 2, 8, 32, 64, 100, 512

    key = jax.random.PRNGKey(0)
    k_params, k_ids = jax.random.split(key, 2)

    params = init_params(k_params, VOCAB, MAX_LEN, H, F)

    # Deterministic synthetic "tokenized" queries (what the tokenizer would emit):
    input_ids = jax.random.randint(k_ids, (B, S), 1, VOCAB, dtype=jnp.int32)
    # second sequence padded after 5 tokens
    attention_mask = jnp.array(
        [[1] * S,
         [1] * 5 + [0] * (S - 5)], dtype=jnp.int32)
    input_ids = input_ids * attention_mask  # pad id = 0

    out = query_encoder_forward(params, input_ids, attention_mask)
    out = jax.block_until_ready(out)

    assert out.shape == (B, H), out.shape
    assert jnp.all(jnp.isfinite(out))
    print("KERNEL_OK")
</pallas_src>

<mosaic_0001>
module attributes {stable_mosaic.version = 11 : i64} {
  func.func @encoder_layer_kernel(%arg0: i32, %arg1: memref<2x8x32xf32, #tpu.memory_space<vmem>>, %arg2: memref<2x1x8xf32, #tpu.memory_space<vmem>>, %arg3: memref<32x32xbf16, #tpu.memory_space<vmem>>, %arg4: memref<32x32xbf16, #tpu.memory_space<vmem>>, %arg5: memref<32x32xbf16, #tpu.memory_space<vmem>>, %arg6: memref<32x32xbf16, #tpu.memory_space<vmem>>, %arg7: memref<32x64xbf16, #tpu.memory_space<vmem>>, %arg8: memref<64x32xbf16, #tpu.memory_space<vmem>>, %arg9: memref<9x32xf32, #tpu.memory_space<vmem>>, %arg10: memref<1x64xf32, #tpu.memory_space<vmem>>, %arg11: memref<2x1x32xf32, #tpu.memory_space<vmem>>) attributes {dimension_semantics = [#tpu.dimension_semantics<parallel>], iteration_bounds = array<i64: 1>, scalar_prefetch = 0 : i64, scratch_operands = 0 : i64, tpu.core_type = #tpu.core_type<tc>, window_params = [{transform_indices = @transform_0, window_bounds = array<i64: 2, 8, 32>}, {transform_indices = @transform_1, window_bounds = array<i64: 2, 1, 8>}, {pipeline_mode = #tpu.pipeline_mode<synchronous>, transform_indices = @transform_2, window_bounds = array<i64: 32, 32>}, {pipeline_mode = #tpu.pipeline_mode<synchronous>, transform_indices = @transform_3, window_bounds = array<i64: 32, 32>}, {pipeline_mode = #tpu.pipeline_mode<synchronous>, transform_indices = @transform_4, window_bounds = array<i64: 32, 32>}, {pipeline_mode = #tpu.pipeline_mode<synchronous>, transform_indices = @transform_5, window_bounds = array<i64: 32, 32>}, {pipeline_mode = #tpu.pipeline_mode<synchronous>, transform_indices = @transform_6, window_bounds = array<i64: 32, 64>}, {pipeline_mode = #tpu.pipeline_mode<synchronous>, transform_indices = @transform_7, window_bounds = array<i64: 64, 32>}, {pipeline_mode = #tpu.pipeline_mode<synchronous>, transform_indices = @transform_8, window_bounds = array<i64: 9, 32>}, {pipeline_mode = #tpu.pipeline_mode<synchronous>, transform_indices = @transform_9, window_bounds = array<i64: 1, 64>}, {transform_indices = @transform_10, window_bounds = array<i64: 2, 1, 32>}]} {
    %c0 = arith.constant 0 : index
    %c0_0 = arith.constant 0 : index
    %c0_1 = arith.constant 0 : index
    %0 = vector.load %arg1[%c0, %c0_0, %c0_1] : memref<2x8x32xf32, #tpu.memory_space<vmem>>, vector<2x8x32xf32>
    %1 = vector.shape_cast %0 : vector<2x8x32xf32> to vector<16x32xf32>
    %2 = arith.truncf %1 : vector<16x32xf32> to vector<16x32xbf16>
    %c0_2 = arith.constant 0 : index
    %c0_3 = arith.constant 0 : index
    %3 = vector.load %arg3[%c0_2, %c0_3] : memref<32x32xbf16, #tpu.memory_space<vmem>>, vector<32x32xbf16>
    %cst = arith.constant dense<0.000000e+00> : vector<16x32xf32>
    %4 = tpu.matmul %2, %3, %cst {dimension_numbers = #tpu.dot_dimension_numbers<[1], [0], [0], [1], [0, 0, 1, 1], [], []>} : vector<16x32xbf16>, vector<32x32xbf16>, vector<16x32xf32> -> vector<16x32xf32>
    %c0_4 = arith.constant 0 : index
    %c0_5 = arith.constant 0 : index
    %5 = vector.load %arg9[%c0_4, %c0_5] : memref<9x32xf32, #tpu.memory_space<vmem>>, vector<1x32xf32>
    %6 = vector.broadcast %5 : vector<1x32xf32> to vector<16x32xf32>
    %7 = arith.addf %4, %6 : vector<16x32xf32>
    %c0_6 = arith.constant 0 : index
    %c0_7 = arith.constant 0 : index
    %8 = vector.load %arg4[%c0_6, %c0_7] : memref<32x32xbf16, #tpu.memory_space<vmem>>, vector<32x32xbf16>
    %cst_8 = arith.constant dense<0.000000e+00> : vector<16x32xf32>
    %9 = tpu.matmul %2, %8, %cst_8 {dimension_numbers = #tpu.dot_dimension_numbers<[1], [0], [0], [1], [0, 0, 1, 1], [], []>} : vector<16x32xbf16>, vector<32x32xbf16>, vector<16x32xf32> -> vector<16x32xf32>
    %c1 = arith.constant 1 : index
    %c0_9 = arith.constant 0 : index
    %10 = vector.load %arg9[%c1, %c0_9] : memref<9x32xf32, #tpu.memory_space<vmem>>, vector<1x32xf32>
    %11 = vector.broadcast %10 : vector<1x32xf32> to vector<16x32xf32>
    %12 = arith.addf %9, %11 : vector<16x32xf32>
    %c0_10 = arith.constant 0 : index
    %c0_11 = arith.constant 0 : index
    %13 = vector.load %arg5[%c0_10, %c0_11] : memref<32x32xbf16, #tpu.memory_space<vmem>>, vector<32x32xbf16>
    %cst_12 = arith.constant dense<0.000000e+00> : vector<16x32xf32>
    %14 = tpu.matmul %2, %13, %cst_12 {dimension_numbers = #tpu.dot_dimension_numbers<[1], [0], [0], [1], [0, 0, 1, 1], [], []>} : vector<16x32xbf16>, vector<32x32xbf16>, vector<16x32xf32> -> vector<16x32xf32>
    %c2 = arith.constant 2 : index
    %c0_13 = arith.constant 0 : index
    %15 = vector.load %arg9[%c2, %c0_13] : memref<9x32xf32, #tpu.memory_space<vmem>>, vector<1x32xf32>
    %16 = vector.broadcast %15 : vector<1x32xf32> to vector<16x32xf32>
    %17 = arith.addf %14, %16 : vector<16x32xf32>
    %18 = vector.shape_cast %7 : vector<16x32xf32> to vector<2x8x32xf32>
    %19 = arith.truncf %18 : vector<2x8x32xf32> to vector<2x8x32xbf16>
    %20 = vector.shape_cast %12 : vector<16x32xf32> to vector<2x8x32xf32>
    %21 = arith.truncf %20 : vector<2x8x32xf32> to vector<2x8x32xbf16>
    %22 = vector.shape_cast %17 : vector<16x32xf32> to vector<2x8x32xf32>
    %23 = arith.truncf %22 : vector<2x8x32xf32> to vector<2x8x32xbf16>
    "tpu.trace_start"() <{level = 10 : i32, message = "bqd,bkd->bqk"}> : () -> ()
    %cst_14 = arith.constant dense<0.000000e+00> : vector<2x8x8xf32>
    %24 = tpu.matmul %19, %21, %cst_14 {dimension_numbers = #tpu.dot_dimension_numbers<[2], [2], [1], [1], [0, 0, 0, 1, 1, 1], [0], [0]>} : vector<2x8x32xbf16>, vector<2x8x32xbf16>, vector<2x8x8xf32> -> vector<2x8x8xf32>
    "tpu.trace_stop"() : () -> ()
    %cst_15 = arith.constant 0.176776692 : f32
    %25 = vector.broadcast %cst_15 : f32 to vector<2x8x8xf32>
    %26 = arith.mulf %24, %25 : vector<2x8x8xf32>
    %c0_16 = arith.constant 0 : index
    %c0_17 = arith.constant 0 : index
    %c0_18 = arith.constant 0 : index
    %27 = vector.load %arg2[%c0_16, %c0_17, %c0_18] : memref<2x1x8xf32, #tpu.memory_space<vmem>>, vector<2x1x8xf32>
    %28 = vector.broadcast %27 : vector<2x1x8xf32> to vector<2x8x8xf32>
    %29 = arith.addf %26, %28 : vector<2x8x8xf32>
    %cst_19 = arith.constant dense<0xFF800000> : vector<2x8xf32>
    %30 = vector.multi_reduction <maximumf>, %29, %cst_19 [2] : vector<2x8x8xf32> to vector<2x8xf32>
    %31 = vector.shape_cast %30 : vector<2x8xf32> to vector<2x8x1xf32>
    %32 = vector.broadcast %31 : vector<2x8x1xf32> to vector<2x8x8xf32>
    %33 = arith.subf %29, %32 : vector<2x8x8xf32>
    %34 = math.exp %33 : vector<2x8x8xf32>
    %cst_20 = arith.constant dense<0.000000e+00> : vector<2x8xf32>
    %35 = vector.multi_reduction <add>, %34, %cst_20 [2] : vector<2x8x8xf32> to vector<2x8xf32>
    %36 = vector.shape_cast %35 : vector<2x8xf32> to vector<2x8x1xf32>
    %37 = tpu.reciprocal %36 {approx = true} : vector<2x8x1xf32> -> vector<2x8x1xf32>
    %38 = vector.broadcast %37 : vector<2x8x1xf32> to vector<2x8x8xf32>
    %39 = arith.mulf %34, %38 : vector<2x8x8xf32>
    %40 = arith.truncf %39 : vector<2x8x8xf32> to vector<2x8x8xbf16>
    "tpu.trace_start"() <{level = 10 : i32, message = "bqk,bkd->bqd"}> : () -> ()
    %cst_21 = arith.constant dense<0.000000e+00> : vector<2x8x32xf32>
    %41 = tpu.matmul %40, %23, %cst_21 {dimension_numbers = #tpu.dot_dimension_numbers<[2], [1], [1], [2], [0, 0, 0, 1, 1, 2], [0], [0]>} : vector<2x8x8xbf16>, vector<2x8x32xbf16>, vector<2x8x32xf32> -> vector<2x8x32xf32>
    "tpu.trace_stop"() : () -> ()
    %42 = vector.shape_cast %41 : vector<2x8x32xf32> to vector<16x32xf32>
    %43 = arith.truncf %42 : vector<16x32xf32> to vector<16x32xbf16>
    %c0_22 = arith.constant 0 : index
    %c0_23 = arith.constant 0 : index
    %44 = vector.load %arg6[%c0_22, %c0_23] : memref<32x32xbf16, #tpu.memory_space<vmem>>, vector<32x32xbf16>
    %cst_24 = arith.constant dense<0.000000e+00> : vector<16x32xf32>
    %45 = tpu.matmul %43, %44, %cst_24 {dimension_numbers = #tpu.dot_dimension_numbers<[1], [0], [0], [1], [0, 0, 1, 1], [], []>} : vector<16x32xbf16>, vector<32x32xbf16>, vector<16x32xf32> -> vector<16x32xf32>
    %c3 = arith.constant 3 : index
    %c0_25 = arith.constant 0 : index
    %46 = vector.load %arg9[%c3, %c0_25] : memref<9x32xf32, #tpu.memory_space<vmem>>, vector<1x32xf32>
    %47 = vector.broadcast %46 : vector<1x32xf32> to vector<16x32xf32>
    %48 = arith.addf %45, %47 : vector<16x32xf32>
    %49 = arith.addf %1, %48 : vector<16x32xf32>
    %c5 = arith.constant 5 : index
    %c0_26 = arith.constant 0 : index
    %50 = vector.load %arg9[%c5, %c0_26] : memref<9x32xf32, #tpu.memory_space<vmem>>, vector<1x32xf32>
    %c6 = arith.constant 6 : index
    %c0_27 = arith.constant 0 : index
    %51 = vector.load %arg9[%c6, %c0_27] : memref<9x32xf32, #tpu.memory_space<vmem>>, vector<1x32xf32>
    %cst_28 = arith.constant dense<0.000000e+00> : vector<16xf32>
    %52 = vector.multi_reduction <add>, %49, %cst_28 [1] : vector<16x32xf32> to vector<16xf32>
    %53 = vector.shape_cast %52 : vector<16xf32> to vector<16x1xf32>
    %cst_29 = arith.constant 3.200000e+01 : f32
    %54 = vector.broadcast %cst_29 : f32 to vector<16x1xf32>
    %55 = arith.divf %53, %54 : vector<16x1xf32>
    %56 = vector.broadcast %55 : vector<16x1xf32> to vector<16x32xf32>
    %57 = arith.subf %49, %56 : vector<16x32xf32>
    %58 = arith.mulf %57, %57 : vector<16x32xf32>
    %cst_30 = arith.constant dense<0.000000e+00> : vector<16xf32>
    %59 = vector.multi_reduction <add>, %58, %cst_30 [1] : vector<16x32xf32> to vector<16xf32>
    %60 = vector.shape_cast %59 : vector<16xf32> to vector<16x1xf32>
    %cst_31 = arith.constant 3.200000e+01 : f32
    %61 = vector.broadcast %cst_31 : f32 to vector<16x1xf32>
    %62 = arith.divf %60, %61 : vector<16x1xf32>
    %63 = vector.broadcast %55 : vector<16x1xf32> to vector<16x32xf32>
    %64 = arith.subf %49, %63 : vector<16x32xf32>
    %cst_32 = arith.constant 9.99999974E-6 : f32
    %65 = vector.broadcast %cst_32 : f32 to vector<16x1xf32>
    %66 = arith.addf %62, %65 : vector<16x1xf32>
    %67 = math.rsqrt %66 : vector<16x1xf32>
    %68 = vector.broadcast %67 : vector<16x1xf32> to vector<16x32xf32>
    %69 = arith.mulf %64, %68 : vector<16x32xf32>
    %70 = vector.broadcast %50 : vector<1x32xf32> to vector<16x32xf32>
    %71 = arith.mulf %69, %70 : vector<16x32xf32>
    %72 = vector.broadcast %51 : vector<1x32xf32> to vector<16x32xf32>
    %73 = arith.addf %71, %72 : vector<16x32xf32>
    %74 = arith.truncf %73 : vector<16x32xf32> to vector<16x32xbf16>
    %c0_33 = arith.constant 0 : index
    %c0_34 = arith.constant 0 : index
    %75 = vector.load %arg7[%c0_33, %c0_34] : memref<32x64xbf16, #tpu.memory_space<vmem>>, vector<32x64xbf16>
    %cst_35 = arith.constant dense<0.000000e+00> : vector<16x64xf32>
    %76 = tpu.matmul %74, %75, %cst_35 {dimension_numbers = #tpu.dot_dimension_numbers<[1], [0], [0], [1], [0, 0, 1, 1], [], []>} : vector<16x32xbf16>, vector<32x64xbf16>, vector<16x64xf32> -> vector<16x64xf32>
    %c0_36 = arith.constant 0 : index
    %c0_37 = arith.constant 0 : index
    %77 = vector.load %arg10[%c0_36, %c0_37] : memref<1x64xf32, #tpu.memory_space<vmem>>, vector<1x64xf32>
    %78 = vector.broadcast %77 : vector<1x64xf32> to vector<16x64xf32>
    %79 = arith.addf %76, %78 : vector<16x64xf32>
    %80 = arith.mulf %79, %79 : vector<16x64xf32>
    %81 = arith.mulf %79, %80 : vector<16x64xf32>
    %cst_38 = arith.constant 4.471500e-02 : f32
    %82 = vector.broadcast %cst_38 : f32 to vector<16x64xf32>
    %83 = arith.mulf %82, %81 : vector<16x64xf32>
    %84 = arith.addf %79, %83 : vector<16x64xf32>
    %cst_39 = arith.constant 0.797884583 : f32
    %85 = vector.broadcast %cst_39 : f32 to vector<16x64xf32>
    %86 = arith.mulf %85, %84 : vector<16x64xf32>
    %87 = math.tanh %86 : vector<16x64xf32>
    %cst_40 = arith.constant 1.000000e+00 : f32
    %88 = vector.broadcast %cst_40 : f32 to vector<16x64xf32>
    %89 = arith.addf %88, %87 : vector<16x64xf32>
    %cst_41 = arith.constant 5.000000e-01 : f32
    %90 = vector.broadcast %cst_41 : f32 to vector<16x64xf32>
    %91 = arith.mulf %90, %89 : vector<16x64xf32>
    %92 = arith.mulf %79, %91 : vector<16x64xf32>
    %93 = arith.truncf %92 : vector<16x64xf32> to vector<16x64xbf16>
    %c0_42 = arith.constant 0 : index
    %c0_43 = arith.constant 0 : index
    %94 = vector.load %arg8[%c0_42, %c0_43] : memref<64x32xbf16, #tpu.memory_space<vmem>>, vector<64x32xbf16>
    %cst_44 = arith.constant dense<0.000000e+00> : vector<16x32xf32>
    %95 = tpu.matmul %93, %94, %cst_44 {dimension_numbers = #tpu.dot_dimension_numbers<[1], [0], [0], [1], [0, 0, 1, 1], [], []>} : vector<16x64xbf16>, vector<64x32xbf16>, vector<16x32xf32> -> vector<16x32xf32>
    %c4 = arith.constant 4 : index
    %c0_45 = arith.constant 0 : index
    %96 = vector.load %arg9[%c4, %c0_45] : memref<9x32xf32, #tpu.memory_space<vmem>>, vector<1x32xf32>
    %97 = vector.broadcast %96 : vector<1x32xf32> to vector<16x32xf32>
    %98 = arith.addf %95, %97 : vector<16x32xf32>
    %99 = arith.addf %73, %98 : vector<16x32xf32>
    %c7 = arith.constant 7 : index
    %c0_46 = arith.constant 0 : index
    %100 = vector.load %arg9[%c7, %c0_46] : memref<9x32xf32, #tpu.memory_space<vmem>>, vector<1x32xf32>
    %c8 = arith.constant 8 : index
    %c0_47 = arith.constant 0 : index
    %101 = vector.load %arg9[%c8, %c0_47] : memref<9x32xf32, #tpu.memory_space<vmem>>, vector<1x32xf32>
    %cst_48 = arith.constant dense<0.000000e+00> : vector<16xf32>
    %102 = vector.multi_reduction <add>, %99, %cst_48 [1] : vector<16x32xf32> to vector<16xf32>
    %103 = vector.shape_cast %102 : vector<16xf32> to vector<16x1xf32>
    %cst_49 = arith.constant 3.200000e+01 : f32
    %104 = vector.broadcast %cst_49 : f32 to vector<16x1xf32>
    %105 = arith.divf %103, %104 : vector<16x1xf32>
    %106 = vector.broadcast %105 : vector<16x1xf32> to vector<16x32xf32>
    %107 = arith.subf %99, %106 : vector<16x32xf32>
    %108 = arith.mulf %107, %107 : vector<16x32xf32>
    %cst_50 = arith.constant dense<0.000000e+00> : vector<16xf32>
    %109 = vector.multi_reduction <add>, %108, %cst_50 [1] : vector<16x32xf32> to vector<16xf32>
    %110 = vector.shape_cast %109 : vector<16xf32> to vector<16x1xf32>
    %cst_51 = arith.constant 3.200000e+01 : f32
    %111 = vector.broadcast %cst_51 : f32 to vector<16x1xf32>
    %112 = arith.divf %110, %111 : vector<16x1xf32>
    %113 = vector.broadcast %105 : vector<16x1xf32> to vector<16x32xf32>
    %114 = arith.subf %99, %113 : vector<16x32xf32>
    %cst_52 = arith.constant 9.99999974E-6 : f32
    %115 = vector.broadcast %cst_52 : f32 to vector<16x1xf32>
    %116 = arith.addf %112, %115 : vector<16x1xf32>
    %117 = math.rsqrt %116 : vector<16x1xf32>
    %118 = vector.broadcast %117 : vector<16x1xf32> to vector<16x32xf32>
    %119 = arith.mulf %114, %118 : vector<16x32xf32>
    %120 = vector.broadcast %100 : vector<1x32xf32> to vector<16x32xf32>
    %121 = arith.mulf %119, %120 : vector<16x32xf32>
    %122 = vector.broadcast %101 : vector<1x32xf32> to vector<16x32xf32>
    %123 = arith.addf %121, %122 : vector<16x32xf32>
    %124 = vector.shape_cast %123 : vector<16x32xf32> to vector<2x8x32xf32>
    %125 = vector.extract_strided_slice %124 {offsets = [0, 0, 0], sizes = [2, 1, 32], strides = [1, 1, 1]} : vector<2x8x32xf32> to vector<2x1x32xf32>
    %c0_53 = arith.constant 0 : index
    %c0_54 = arith.constant 0 : index
    %c0_55 = arith.constant 0 : index
    %126 = vector.load %arg11[%c0_53, %c0_54, %c0_55] : memref<2x1x32xf32, #tpu.memory_space<vmem>>, vector<2x1x32xf32>
    tpu.vector_store %arg11[%c0_53, %c0_54, %c0_55], %125 {strides = array<i32>} : memref<2x1x32xf32, #tpu.memory_space<vmem>>, vector<2x1x32xf32>,
    return
  }
  func.func @transform_0(%arg0: i32) -> (i32, i32, i32) {
    %c0_i32 = arith.constant 0 : i32
    %c0_i32_0 = arith.constant 0 : i32
    %c0_i32_1 = arith.constant 0 : i32
    return %arg0, %c0_i32, %c0_i32_0 : i32, i32, i32
  }
  func.func @transform_1(%arg0: i32) -> (i32, i32, i32) {
    %c0_i32 = arith.constant 0 : i32
    %c0_i32_0 = arith.constant 0 : i32
    %c0_i32_1 = arith.constant 0 : i32
    return %arg0, %c0_i32, %c0_i32_0 : i32, i32, i32
  }
  func.func @transform_2(%arg0: i32) -> (i32, i32) {
    %c0_i32 = arith.constant 0 : i32
    %c0_i32_0 = arith.constant 0 : i32
    %c0_i32_1 = arith.constant 0 : i32
    return %c0_i32, %c0_i32_0 : i32, i32
  }
  func.func @transform_3(%arg0: i32) -> (i32, i32) {
    %c0_i32 = arith.constant 0 : i32
    %c0_i32_0 = arith.constant 0 : i32
    %c0_i32_1 = arith.constant 0 : i32
    return %c0_i32, %c0_i32_0 : i32, i32
  }
  func.func @transform_4(%arg0: i32) -> (i32, i32) {
    %c0_i32 = arith.constant 0 : i32
    %c0_i32_0 = arith.constant 0 : i32
    %c0_i32_1 = arith.constant 0 : i32
    return %c0_i32, %c0_i32_0 : i32, i32
  }
  func.func @transform_5(%arg0: i32) -> (i32, i32) {
    %c0_i32 = arith.constant 0 : i32
    %c0_i32_0 = arith.constant 0 : i32
    %c0_i32_1 = arith.constant 0 : i32
    return %c0_i32, %c0_i32_0 : i32, i32
  }
  func.func @transform_6(%arg0: i32) -> (i32, i32) {
    %c0_i32 = arith.constant 0 : i32
    %c0_i32_0 = arith.constant 0 : i32
    %c0_i32_1 = arith.constant 0 : i32
    return %c0_i32, %c0_i32_0 : i32, i32
  }
  func.func @transform_7(%arg0: i32) -> (i32, i32) {
    %c0_i32 = arith.constant 0 : i32
    %c0_i32_0 = arith.constant 0 : i32
    %c0_i32_1 = arith.constant 0 : i32
    return %c0_i32, %c0_i32_0 : i32, i32
  }
  func.func @transform_8(%arg0: i32) -> (i32, i32) {
    %c0_i32 = arith.constant 0 : i32
    %c0_i32_0 = arith.constant 0 : i32
    %c0_i32_1 = arith.constant 0 : i32
    return %c0_i32, %c0_i32_0 : i32, i32
  }
  func.func @transform_9(%arg0: i32) -> (i32, i32) {
    %c0_i32 = arith.constant 0 : i32
    %c0_i32_0 = arith.constant 0 : i32
    %c0_i32_1 = arith.constant 0 : i32
    return %c0_i32, %c0_i32_0 : i32, i32
  }
  func.func @transform_10(%arg0: i32) -> (i32, i32, i32) {
    %c0_i32 = arith.constant 0 : i32
    %c0_i32_0 = arith.constant 0 : i32
    %c0_i32_1 = arith.constant 0 : i32
    return %arg0, %c0_i32, %c0_i32_0 : i32, i32, i32
  }
}

</mosaic_0001>

<bundles_post_ra>
// kernel: tpu_custom_call.1
= control target key start
LH: loop header
LB: loop body
LE: loop exit
PB: predicated region body
PF: predicated region fallthrough
CT: control target
= control target key end

     0   :  { %15 = vsyncpa [#allocation3], 0  ;;  %s1697_s0 = inlined_call_operand.hbm [shape: f32[2,8,32], index: 0, kind: input, shape index: {}]   ;;  %s1698_s1 = inlined_call_operand.hbm [shape: f32[2,1,8], index: 1, kind: input, shape index: {}]   ;;  %s1699_s2 = inlined_call_operand.hbm [shape: bf16[32,32], index: 2, kind: input, shape index: {}]   ;;  %s1700_s3 = inlined_call_operand.hbm [shape: bf16[32,32], index: 3, kind: input, shape index: {}]   ;;  %s1701_s4 = inlined_call_operand.hbm [shape: bf16[32,32], index: 4, kind: input, shape index: {}]   ;;  %s1702_s5 = inlined_call_operand.hbm [shape: bf16[32,32], index: 5, kind: input, shape index: {}]   ;;  %s1703_s6 = inlined_call_operand.hbm [shape: bf16[32,64], index: 6, kind: input, shape index: {}]   ;;  %s1704_s7 = inlined_call_operand.hbm [shape: bf16[64,32], index: 7, kind: input, shape index: {}]   ;;  %s1705_s8 = inlined_call_operand.hbm [shape: f32[9,32], index: 8, kind: input, shape index: {}]   ;;  %s1706_s9 = inlined_call_operand.hbm [shape: f32[1,64], index: 9, kind: input, shape index: {}]   ;;  %s1707_s10 = inlined_call_operand.hbm [shape: f32[2,1,32], index: 10, kind: output, shape index: {}]  }
   0x1   :  { %16 = vsyncpa [#allocation6], 0 }
   0x2   :  { %17 = vsyncpa [#allocation9], 0 }
   0x3   :  { %18 = vsyncpa [#allocation12], 0 }
   0x4   :  { %19 = vsyncpa [#allocation15], 0 }
   0x5   :  { %20 = vsyncpa [#allocation18], 0 }
   0x6   :  { %21 = vsyncpa [#allocation4], 0  ;;  %s1392_s13 = smov [#allocation5]   ;;  %s1136_s17 = scalar_lea.hbm %s1698_s1, 32 }
   0x7   :  { %s39_s14 = sshll.u32 %s1392_s13, 4  ;;  %p1137_p0 = scmp.ne.s32.totalorder %s1698_s1, %s1136_s17  ;;  %s40_s14 = int_to_ptr.vmem [resolvable:$true] %s39_s14 }
   0x8   :  { %p1140_p1 = scmp.lt.u32.totalorder %s1136_s17, %s1698_s1 }
   0xa   :  { %p1142_p2 = pnand %p1140_p1, %p1137_p0 }
   0xc   :  { %1145 = shalt.err (!%p1142_p2)
}
   0xd   :  { %s1146_s22 = scalar_lea.vmem %s40_s14, 32  ;;  %p1151_p4 = scmp.lt.s32.totalorder %s40_s14, %s40_s14 }
   0xe   :  { %p1147_p3 = scmp.ne.s32.totalorder %s40_s14, %s1146_s22  ;;  %p1152_p5 = scmp.lt.s32.totalorder %s1146_s22, %s1146_s22 }
  0x10   :  { %p1153_p6 = por %p1152_p5, %p1151_p4 }
  0x12   :  { %p1154_p7 = pnand %p1153_p6, %p1147_p3 }
  0x14   :  { %1157 = shalt.err (!%p1154_p7)
}
  0x15   :  { %s1393_s23 = smov 16   ;;  %s1394_s24 = smov 1  }
  0x16   :  { %45 = dma.hbm_to_vmem [thread:$0]  %s1698_s1, 32, %s40_s14, [#allocation6], %s1393_s23, %s1393_s23, %s1394_s24  }
  0x17   :  { %s1395_s27 = smov [#allocation8]   ;;  %s1396_s29 = smov [#allocation11]  }
  0x18   :  { %s63_s28 = sshll.u32 %s1395_s27, 4  ;;  %s87_s30 = sshll.u32 %s1396_s29, 4  ;;  %s64_s28 = int_to_ptr.vmem [resolvable:$true] %s63_s28  ;;  %s88_s30 = int_to_ptr.vmem [resolvable:$true] %s87_s30 }
  0x19   :  { %s1158_s13 = scalar_lea.hbm %s1700_s3, 256 }
  0x1a   :  { %p1159_p8 = scmp.ne.s32.totalorder %s1700_s3, %s1158_s13  ;;  %p1162_p9 = scmp.lt.u32.totalorder %s1158_s13, %s1700_s3 }
  0x1c   :  { %p1164_p10 = pnand %p1162_p9, %p1159_p8 }
  0x1e   :  { %1167 = shalt.err (!%p1164_p10)
}
  0x1f   :  { %s1168_s1 = scalar_lea.vmem %s64_s28, 256  ;;  %p1173_p12 = scmp.lt.s32.totalorder %s64_s28, %s64_s28 }
  0x20   :  { %p1169_p11 = scmp.ne.s32.totalorder %s64_s28, %s1168_s1  ;;  %p1174_p13 = scmp.lt.s32.totalorder %s1168_s1, %s1168_s1 }
  0x22   :  { %p1175_p0 = por %p1174_p13, %p1173_p12 }
  0x24   :  { %p1176_p1 = pnand %p1175_p0, %p1169_p11 }
  0x26   :  { %1179 = shalt.err (!%p1176_p1)
}
  0x27   :  { %s1397_s14 = smov 64   ;;  %s1398_s19 = smov 4  }
  0x28   :  { %69 = dma.hbm_to_vmem [thread:$0]  %s1700_s3, 256, %s64_s28, [#allocation9], %s1397_s14, %s1397_s14, %s1398_s19  }
  0x29   :  { %s1180_s26 = scalar_lea.hbm %s1702_s5, 256 }
  0x2a   :  { %p1181_p2 = scmp.ne.s32.totalorder %s1702_s5, %s1180_s26  ;;  %p1184_p3 = scmp.lt.u32.totalorder %s1180_s26, %s1702_s5 }
  0x2c   :  { %p1186_p4 = pnand %p1184_p3, %p1181_p2 }
  0x2e   :  { %1189 = shalt.err (!%p1186_p4)
}
  0x2f   :  { %s1190_s13 = scalar_lea.vmem %s88_s30, 256  ;;  %p1195_p6 = scmp.lt.s32.totalorder %s88_s30, %s88_s30 }
  0x30   :  { %p1191_p5 = scmp.ne.s32.totalorder %s88_s30, %s1190_s13  ;;  %p1196_p7 = scmp.lt.s32.totalorder %s1190_s13, %s1190_s13 }
  0x32   :  { %p1197_p8 = por %p1196_p7, %p1195_p6 }
  0x34   :  { %p1198_p9 = pnand %p1197_p8, %p1191_p5 }
  0x36   :  { %1201 = shalt.err (!%p1198_p9)
}
  0x37   :  { %93 = dma.hbm_to_vmem [thread:$0]  %s1702_s5, 256, %s88_s30, [#allocation12], %s1397_s14, %s1397_s14, %s1398_s19  }
  0x38   :  { %s1399_s15 = smov [#allocation14]   ;;  %s1400_s17 = smov [#allocation2]  }
  0x39   :  { %s111_s16 = sshll.u32 %s1399_s15, 4  ;;  %s27_s18 = sshll.u32 %s1400_s17, 4  ;;  %s112_s16 = int_to_ptr.vmem [resolvable:$true] %s111_s16  ;;  %s28_s18 = int_to_ptr.vmem [resolvable:$true] %s27_s18 }
  0x3a   :  { %s1202_s21 = scalar_lea.hbm %s1704_s7, 512 }
  0x3b   :  { %p1203_p10 = scmp.ne.s32.totalorder %s1704_s7, %s1202_s21  ;;  %p1206_p11 = scmp.lt.u32.totalorder %s1202_s21, %s1704_s7 }
  0x3d   :  { %p1208_p12 = pnand %p1206_p11, %p1203_p10 }
  0x3f   :  { %1211 = shalt.err (!%p1208_p12)
}
  0x40   :  { %s1212_s5 = scalar_lea.vmem %s112_s16, 512  ;;  %p1217_p0 = scmp.lt.s32.totalorder %s112_s16, %s112_s16 }
  0x41   :  { %p1213_p13 = scmp.ne.s32.totalorder %s112_s16, %s1212_s5  ;;  %p1218_p1 = scmp.lt.s32.totalorder %s1212_s5, %s1212_s5 }
  0x43   :  { %p1219_p2 = por %p1218_p1, %p1217_p0 }
  0x45   :  { %p1220_p3 = pnand %p1219_p2, %p1213_p13 }
  0x47   :  { %1223 = shalt.err (!%p1220_p3)
}
  0x48   :  { %117 = dma.hbm_to_vmem [thread:$0]  %s1704_s7, 512, %s112_s16, [#allocation15], %s1397_s14, %s1397_s14, %s1398_s19  }
  0x49   :  { %s1224_s13 = scalar_lea.hbm %s1697_s0, 256 }
  0x4a   :  { %p1225_p4 = scmp.ne.s32.totalorder %s1697_s0, %s1224_s13  ;;  %p1228_p5 = scmp.lt.u32.totalorder %s1224_s13, %s1697_s0 }
  0x4c   :  { %p1230_p6 = pnand %p1228_p5, %p1225_p4 }
  0x4e   :  { %1233 = shalt.err (!%p1230_p6)
}
  0x4f   :  { %s1234_s1 = scalar_lea.vmem %s28_s18, 256  ;;  %p1239_p8 = scmp.lt.s32.totalorder %s28_s18, %s28_s18 }
  0x50   :  { %p1235_p7 = scmp.ne.s32.totalorder %s28_s18, %s1234_s1  ;;  %p1240_p9 = scmp.lt.s32.totalorder %s1234_s1, %s1234_s1 }
  0x52   :  { %p1241_p10 = por %p1240_p9, %p1239_p8 }
  0x54   :  { %p1242_p11 = pnand %p1241_p10, %p1235_p7 }
  0x56   :  { %1245 = shalt.err (!%p1242_p11)
}
  0x57   :  { %s1401_s7 = smov 128   ;;  %s1402_s16 = smov 8  }
  0x58   :  { %33 = dma.hbm_to_vmem [thread:$0]  %s1697_s0, 256, %s28_s18, [#allocation3], %s1401_s7, %s1401_s7, %s1402_s16  }
  0x59   :  { %s1403_s22 = smov [#allocation7]   ;;  %s1404_s26 = smov [#allocation10]  }
  0x5a   :  { %s51_s25 = sshll.u32 %s1403_s22, 4  ;;  %s75_s27 = sshll.u32 %s1404_s26, 4  ;;  %s52_s25 = int_to_ptr.vmem [resolvable:$true] %s51_s25  ;;  %s76_s27 = int_to_ptr.vmem [resolvable:$true] %s75_s27 }
  0x5b   :  { %s1246_s29 = scalar_lea.hbm %s1699_s2, 256 }
  0x5c   :  { %p1247_p12 = scmp.ne.s32.totalorder %s1699_s2, %s1246_s29  ;;  %p1250_p13 = scmp.lt.u32.totalorder %s1246_s29, %s1699_s2 }
  0x5e   :  { %p1252_p0 = pnand %p1250_p13, %p1247_p12 }
  0x60   :  { %1255 = shalt.err (!%p1252_p0)
}
  0x61   :  { %s1256_s0 = scalar_lea.vmem %s52_s25, 256  ;;  %p1261_p2 = scmp.lt.s32.totalorder %s52_s25, %s52_s25 }
  0x62   :  { %p1257_p1 = scmp.ne.s32.totalorder %s52_s25, %s1256_s0  ;;  %p1262_p3 = scmp.lt.s32.totalorder %s1256_s0, %s1256_s0 }
  0x64   :  { %p1263_p4 = por %p1262_p3, %p1261_p2 }
  0x66   :  { %p1264_p5 = pnand %p1263_p4, %p1257_p1 }
  0x68   :  { %1267 = shalt.err (!%p1264_p5)
}
  0x69   :  { %57 = dma.hbm_to_vmem [thread:$0]  %s1699_s2, 256, %s52_s25, [#allocation6], %s1397_s14, %s1397_s14, %s1398_s19  }
  0x6a   :  { %s1268_s1 = scalar_lea.hbm %s1701_s4, 256 }
  0x6b   :  { %p1269_p6 = scmp.ne.s32.totalorder %s1701_s4, %s1268_s1  ;;  %p1272_p7 = scmp.lt.u32.totalorder %s1268_s1, %s1701_s4 }
  0x6d   :  { %p1274_p8 = pnand %p1272_p7, %p1269_p6 }
  0x6f   :  { %1277 = shalt.err (!%p1274_p8)
}
  0x70   :  { %s1278_s5 = scalar_lea.vmem %s76_s27, 256  ;;  %p1283_p10 = scmp.lt.s32.totalorder %s76_s27, %s76_s27 }
  0x71   :  { %p1279_p9 = scmp.ne.s32.totalorder %s76_s27, %s1278_s5  ;;  %p1284_p11 = scmp.lt.s32.totalorder %s1278_s5, %s1278_s5 }
  0x73   :  { %p1285_p12 = por %p1284_p11, %p1283_p10 }
  0x75   :  { %p1286_p13 = pnand %p1285_p12, %p1279_p9 }
  0x77   :  { %1289 = shalt.err (!%p1286_p13)
}
  0x78   :  { %81 = dma.hbm_to_vmem [thread:$0]  %s1701_s4, 256, %s76_s27, [#allocation9], %s1397_s14, %s1397_s14, %s1398_s19  }
  0x79   :  { %s1405_s30 = smov [#allocation13]   ;;  %s1406_s11 = smov [#allocation16]  }
  0x7a   :  { %s99_s29 = sshll.u32 %s1405_s30, 4  ;;  %s123_s12 = sshll.u32 %s1406_s11, 4  ;;  %s100_s29 = int_to_ptr.vmem [resolvable:$true] %s99_s29  ;;  %s124_s12 = int_to_ptr.vmem [resolvable:$true] %s123_s12 }
  0x7b   :  { %s1290_s0 = scalar_lea.hbm %s1703_s6, 256 }
  0x7c   :  { %p1291_p0 = scmp.ne.s32.totalorder %s1703_s6, %s1290_s0  ;;  %p1294_p1 = scmp.lt.u32.totalorder %s1290_s0, %s1703_s6 }
  0x7e   :  { %p1296_p2 = pnand %p1294_p1, %p1291_p0 }
  0x80   :  { %1299 = shalt.err (!%p1296_p2)
}
  0x81   :  { %s1300_s4 = scalar_lea.vmem %s100_s29, 256  ;;  %p1305_p4 = scmp.lt.s32.totalorder %s100_s29, %s100_s29 }
  0x82   :  { %p1301_p3 = scmp.ne.s32.totalorder %s100_s29, %s1300_s4  ;;  %p1306_p5 = scmp.lt.s32.totalorder %s1300_s4, %s1300_s4 }
  0x84   :  { %p1307_p6 = por %p1306_p5, %p1305_p4 }
  0x86   :  { %p1308_p7 = pnand %p1307_p6, %p1301_p3 }
  0x88   :  { %1311 = shalt.err (!%p1308_p7)
}
  0x89   :  { %105 = dma.hbm_to_vmem [thread:$0]  %s1703_s6, 256, %s100_s29, [#allocation12], %s1397_s14, %s1397_s14, %s1398_s19  }
  0x8a   :  { %s1312_s22 = scalar_lea.hbm %s1705_s8, 256 }
  0x8b   :  { %p1313_p8 = scmp.ne.s32.totalorder %s1705_s8, %s1312_s22  ;;  %p1316_p9 = scmp.lt.u32.totalorder %s1312_s22, %s1705_s8 }
  0x8d   :  { %p1318_p10 = pnand %p1316_p9, %p1313_p8 }
  0x8f   :  { %1321 = shalt.err (!%p1318_p10)
}
  0x90   :  { %s1322_s30 = scalar_lea.vmem %s124_s12, 256  ;;  %p1327_p12 = scmp.lt.s32.totalorder %s124_s12, %s124_s12 }
  0x91   :  { %p1323_p11 = scmp.ne.s32.totalorder %s124_s12, %s1322_s30  ;;  %p1328_p13 = scmp.lt.s32.totalorder %s1322_s30, %s1322_s30 }
  0x93   :  { %p1329_p0 = por %p1328_p13, %p1327_p12 }
  0x95   :  { %p1330_p1 = pnand %p1329_p0, %p1323_p11 }
  0x97   :  { %1333 = shalt.err (!%p1330_p1)
}
  0x98   :  { %129 = dma.hbm_to_vmem [thread:$0]  %s1705_s8, 256, %s124_s12, [#allocation15], %s1401_s7, %s1401_s7, %s1402_s16  }
  0x99   :  { %s1407_s19 = smov [#allocation17]   ;;  %s1334_s3 = scalar_lea.hbm %s1706_s9, 16 }
  0x9a   :  { %s136_s29 = sshll.u32 %s1407_s19, 4  ;;  %p1335_p2 = scmp.ne.s32.totalorder %s1706_s9, %s1334_s3  ;;  %s137_s29 = int_to_ptr.vmem [resolvable:$true] %s136_s29 }
  0x9b   :  { %p1338_p3 = scmp.lt.u32.totalorder %s1334_s3, %s1706_s9 }
  0x9d   :  { %p1340_p4 = pnand %p1338_p3, %p1335_p2 }
  0x9f   :  { %1343 = shalt.err (!%p1340_p4)
}
  0xa0   :  { %s1344_s17 = scalar_lea.vmem %s137_s29, 16  ;;  %s1348_s8 = scalar_lea.vmem %s137_s29, 32 }
  0xa1   :  { %p1345_p5 = scmp.ne.s32.totalorder %s137_s29, %s1344_s17  ;;  %p1349_p6 = scmp.lt.s32.totalorder %s137_s29, %s137_s29 }
  0xa2   :  { %p1350_p7 = scmp.lt.s32.totalorder %s1348_s8, %s1344_s17 }
  0xa4   :  { %p1351_p8 = por %p1350_p7, %p1349_p6 }
  0xa6   :  { %p1352_p9 = pnand %p1351_p8, %p1345_p5 }
  0xa8   :  { %1355 = shalt.err (!%p1352_p9)
}
  0xa9   :  { %139 = dma.hbm_to_vmem [thread:$0]  %s1706_s9, 16, %s137_s29, [#allocation18]  }
  0xaa   :  { %1378 = dma.done.wait [#allocation3], 256  }
  0xab   :  { %1379 = vsyncadd [#allocation3], 4294967040 }
  0xac   :  { %1380 = dma.done.wait [#allocation6], 288  }
  0xad   :  { %1381 = vsyncadd [#allocation6], 4294967008 }
  0xae   :  { %1382 = dma.done.wait [#allocation9], 512  }
  0xaf   :  { %1383 = vsyncadd [#allocation9], 4294966784 }
  0xb0   :  { %1384 = dma.done.wait [#allocation12], 512  }
  0xb1   :  { %1385 = vsyncadd [#allocation12], 4294966784 }
  0xb2   :  { %1386 = dma.done.wait [#allocation15], 768  }
  0xb3   :  { %1387 = vsyncadd [#allocation15], 4294966528 }
  0xb4   :  { %1388 = dma.done.wait [#allocation18], 16  }
  0xb5   :  { %1389 = vsyncadd [#allocation18], 4294967280  ;;  %v1408_v0 = vmov 0.0   ;;  %vm1409_vm0 = vmmov 0   ;;  %v1102_v1 = vld [vmem:[#allocation8] sm:$0xff]   ;;  %v1103_v2 = vld [vmem:[#allocation8 + $0x8] sm:$0xff]  }
  0xb6   :  { %1015 = vmatprep.subr.bf16.mxu1 %v1408_v0  ;;  %1007 = vmatprep.subr.bf16.mxu0 %v1408_v0  ;;  %v1104_v3 = vld [vmem:[#allocation7] sm:$0xff]   ;;  %v1620_v4 = vld [vmem:[#allocation2] sm:$0xff]  ;;  %v1622_v5 = vld [vmem:[#allocation2 + $0x8] sm:$0xff]  ;;  %vm195_vm1 = vcmask 261120   ;;  %vm508_vm2 = vcmask 1043456   ;;  %vm480_vm3 = vcmask 64512  }
  0xb7   :  { %1019 = vmatprep.mubr.msk.bf16.mxu1 %vm1409_vm0, %v1408_v0  ;;  %1011 = vmatprep.mubr.msk.bf16.mxu0 %vm1409_vm0, %v1408_v0  ;;  %v1105_v6 = vld [vmem:[#allocation7 + $0x8] sm:$0xff]   ;;  %v173_v7 = vpack.c.bf16 %v1622_v5, %v1620_v4  ;;  %v1106_v8 = vld [vmem:[#allocation10] sm:$0xff]   ;;  %v947_v10 = vld [vmem:[#allocation16 + $0x1] ss:$0 sm:$0xff]  ;;  %vm831_vm4 = vcmask 523264   ;;  %vm918_vm5 = vcmask 253952  }
  0xb8   :  { %1016 = vmatpush3.bf16.msra.mxu1 %v1102_v1  ;;  %1008 = vmatpush3.bf16.msra.mxu0 %v1104_v3  ;;  %v1107_v9 = vld [vmem:[#allocation10 + $0x8] sm:$0xff]   ;;  %v943_v15 = vld [vmem:[#allocation16] ss:$0 sm:$0xff]  ;;  %v951_v27 = vld [vmem:[#allocation16 + $0x2] ss:$0 sm:$0xff]  ;;  %s1410_s9 = smov [#allocation19]  }
  0xb9   :  { %1017 = vmatprep.subr.bf16.mxu1 %v1408_v0  ;;  %1009 = vmatprep.subr.bf16.mxu0 %v1408_v0  ;;  %v957_v42 = vld [vmem:[#allocation5] ss:$0 sm:$0xff]  ;;  %v958_v47 = vld [vmem:[#allocation5 + $0x1] ss:$0 sm:$0xff]  ;;  %s926_s12 = sshll.u32 %s1410_s9, 4  ;;  %s927_s12 = int_to_ptr.vmem [resolvable:$true] %s926_s12 }
  0xba   :  { %s1356_s4 = scalar_lea.vmem %s927_s12, 32  ;;  %p1361_p11 = scmp.lt.s32.totalorder %s927_s12, %s927_s12 }
  0xbb   :  { %p1357_p10 = scmp.ne.s32.totalorder %s927_s12, %s1356_s4  ;;  %p1362_p12 = scmp.lt.s32.totalorder %s1356_s4, %s1356_s4 }
  0xbc   :  { %1018 = vmatpush3.bf16.msra.mxu1 %v1103_v2  ;;  %1010 = vmatpush3.bf16.msra.mxu0 %v1105_v6 }
  0xbd   :  { %1031 = vmatprep.subr.bf16.mxu1 %v1408_v0  ;;  %1023 = vmatprep.subr.bf16.mxu0 %v1408_v0  ;;  %p1363_p13 = por %p1362_p12, %p1361_p11 }
  0xbf   :  { %1020 = vmatmul.mubr.msk.bf16.vlgmr.msra.gmra.mrb[0].mxu1 %vm195_vm1, %v173_v7  ;;  %1012 = vmatmul.mubr.msk.bf16.vlgmr.msra.gmra.mrb[0].mxu0 %vm195_vm1, %v173_v7  ;;  %p1364_p0 = pnand %p1363_p13, %p1357_p10 }
  0xc0   :  { %1033 = vmatprep.mubr.msk.bf16.mxu1 %vm1409_vm0, %v1408_v0  ;;  %1024 = vmatpush3.bf16.msra.mxu0 %v1106_v8 }
  0xc1   :  { %1027 = vmatprep.mubr.msk.bf16.mxu0 %vm1409_vm0, %v1408_v0  ;;  %1025 = vmatprep.subr.bf16.mxu0 %v1408_v0 }
  0xc4   :  { %1026 = vmatpush3.bf16.msra.mxu0 %v1107_v9 }
  0xc5   :  { %1037 = vmatprep.subr.bf16.mxu0 %v1408_v0 }
  0xc7   :  { %1028 = vmatmul.mubr.msk.bf16.vlgmr.msra.gmra.mrb[4].mxu0 %vm195_vm1, %v173_v7 }
  0xc8   :  { %1039 = vmatprep.mubr.msk.bf16.mxu0 %vm1409_vm0, %v1408_v0 }
 0x192   :  { %v295_v11 = vpop.f32.mrb[0].mxu1  ;;  %v233_v16 = vpop.f32.mrb[0].mxu0 }
 0x193   :  { %v296_v12 = vadd.f32 %v947_v10, %v295_v11  ;;  %v1021_v13 = vpop.f32.mrb[1].mxu1  ;;  %v1013_v20 = vpop.f32.mrb[1].mxu0  ;;  %v234_v24 = vadd.f32 %v943_v15, %v233_v16 }
 0x194   :  { %v298_v14 = vpop.f32.mrb[2].mxu1  ;;  %v236_v21 = vpop.f32.mrb[2].mxu0 }
 0x195   :  { %v366_v17 = vpack.c.bf16 %v296_v12, %v296_v12  ;;  %v299_v18 = vadd.f32 %v947_v10, %v298_v14  ;;  %v1022_v19 = vpop.f32.mrb[3].mxu1  ;;  %v1014_v25 = vpop.f32.mrb[3].mxu0  ;;  %v364_v28 = vpack.c.bf16 %v234_v24, %v234_v24  ;;  %v237_v29 = vadd.f32 %v943_v15, %v236_v21  ;;  %v1108_v14 = vld [vmem:[#allocation11] sm:$0xff]   ;;  %v1109_v15 = vld [vmem:[#allocation11 + $0x8] sm:$0xff]  }
 0x196   :  { %v961_v25 = vld [vmem:[#allocation16 + $0x3] ss:$0 sm:$0xff] }
 0x197   :  { %v374_v22 = vsel %vm195_vm1, %v366_v17, 0  ;;  %v367_v23 = vpack.c.bf16 %v299_v18, %v299_v18  ;;  %v365_v34 = vpack.c.bf16 %v237_v29, %v237_v29 }
 0x198   :  { %1032 = vmatpush3.bf16.xpose.msra.mxu1 %v374_v22 }
 0x199   :  { %v420_v26 = vsel %vm195_vm1, %v367_v23, 0  ;;  %1043 = vmatprep.subr.bf16.mxu1 %v1408_v0 }
 0x19a   :  { %1038 = vmatpush3.bf16.xpose.msra.mxu0 %v420_v26  ;;  %v357_v30 = vpop.f32.mrb[4].mxu0 }
 0x19b   :  { %1049 = vmatprep.subr.bf16.mxu0 %v1408_v0  ;;  %v358_v31 = vadd.f32 %v951_v27, %v357_v30  ;;  %v1029_v32 = vpop.f32.mrb[5].mxu0 }
 0x19c   :  { %v360_v33 = vpop.f32.mrb[6].mxu0 }
 0x19d   :  { %v368_v35 = vpack.c.bf16 %v358_v31, %v358_v31  ;;  %v361_v36 = vadd.f32 %v951_v27, %v360_v33  ;;  %v1030_v37 = vpop.f32.mrb[7].mxu0 }
 0x19f   :  { %1034 = vmatmul.mubr.msk.bf16.vlgmr.msra.gmra.mrb[4].mxu1 %vm195_vm1, %v364_v28  ;;  %v510_v38 = vsel %vm508_vm2, %v368_v35, 0  ;;  %v369_v39 = vpack.c.bf16 %v361_v36, %v361_v36 }
 0x1a0   :  { %1045 = vmatprep.mubr.msk.bf16.mxu1 %vm1409_vm0, %v1408_v0  ;;  %1044 = vmatpush3.bf16.msra.mxu1 %v510_v38 }
 0x1a1   :  { %1040 = vmatmul.mubr.msk.bf16.vlgmr.msra.gmra.mrb[8].mxu0 %vm195_vm1, %v365_v34  ;;  %v556_v40 = vsel %vm508_vm2, %v369_v39, 0  ;;  %1055 = vmatprep.subr.bf16.mxu1 %v1408_v0 }
 0x1a2   :  { %1051 = vmatprep.mubr.msk.bf16.mxu0 %vm1409_vm0, %v1408_v0  ;;  %1050 = vmatpush3.bf16.msra.mxu0 %v556_v40 }
 0x1a3   :  { %1063 = vmatprep.subr.bf16.mxu0 %v1408_v0 }
 0x272   :  { %v410_v41 = vpop.f32.mrb[4].mxu1 }
 0x273   :  { %v462_v43 = vmul.f32 0.17677669, %v410_v41  ;;  %v1035_v44 = vpop.f32.mrb[5].mxu1 }
 0x274   :  { %v413_v45 = vpop.f32.mrb[6].mxu1  ;;  %v456_v46 = vpop.f32.mrb[8].mxu0 }
 0x275   :  { %v463_v48 = vmul.f32 0.17677669, %v456_v46  ;;  %v1036_v49 = vpop.f32.mrb[7].mxu1  ;;  %v1041_v50 = vpop.f32.mrb[9].mxu0  ;;  %v478_v51 = vadd.f32 %v957_v42, %v462_v43  ;;  %v1110_v45 = vld [vmem:[#allocation13] sm:$0xff]  }
 0x276   :  { %v459_v52 = vpop.f32.mrb[10].mxu0 }
 0x277   :  { %v1042_v53 = vpop.f32.mrb[11].mxu0  ;;  %v481_v54 = vsel %vm480_vm3, %v478_v51, -inf  ;;  %v479_v55 = vadd.f32 %v958_v47, %v463_v48 }
 0x278   :  { %482 = vmax.xlane.f32.xlu0 %v481_v54  ;;  %v965_v53 = vld [vmem:[#allocation16 + $0x5] ss:$0 sm:$0xff] }
 0x279   :  { %v484_v56 = vsel %vm480_vm3, %v479_v55, -inf }
 0x27c   :  { %485 = vmax.xlane.f32.xlu0 %v484_v56 }
 0x305   :  { %v483_v57 = vpop.xlane.xlu0 %482 }
 0x306   :  { %v487_v58 = vsub.f32 %v478_v51, %v483_v57 }
 0x308   :  { %v489_v59 = vmul.f32 1.442695, %v487_v58  ;;  %v966_v58 = vld [vmem:[#allocation16 + $0x6] ss:$0 sm:$0xff] }
 0x309   :  { %v486_v60 = vpop.xlane.xlu0 %485 }
 0x30a   :  { %1116 = vpow2.f32 %v489_v59  ;;  %v488_v61 = vsub.f32 %v479_v55, %v486_v60 }
 0x30c   :  { %v491_v62 = vmul.f32 1.442695, %v488_v61 }
 0x30e   :  { %1118 = vpow2.f32 %v491_v62 }
 0x314   :  { %v1117_v63 = vpop.eup %1116 }
 0x315   :  { %v493_v1 = vsel %vm480_vm3, %v1117_v63, 0.0 }
 0x316   :  { %494 = vadd.xlane.f32.xlu1 %v493_v1  ;;  %v1113_v1 = vld [vmem:[#allocation14 + $0x8] sm:$0xff]  }
 0x318   :  { %v1119_v2 = vpop.eup %1118 }
 0x319   :  { %v496_v3 = vsel %vm480_vm3, %v1119_v2, 0.0 }
 0x31a   :  { %497 = vadd.xlane.f32.xlu1 %v496_v3  ;;  %v1115_v3 = vld [vmem:[#allocation14 + $0x18] sm:$0xff]  }
 0x3a3   :  { %v495_v6 = vpop.xlane.xlu1 %494 }
 0x3a4   :  { %1120 = vrcp.f32 %v495_v6  ;;  %v967_v6 = vld [vmem:[#allocation17] ss:$0 sm:$0xff] }
 0x3a7   :  { %v498_v7 = vpop.xlane.xlu1 %497 }
 0x3a8   :  { %1122 = vrcp.f32 %v498_v7 }
 0x3ae   :  { %v1121_v8 = vpop.eup %1120 }
 0x3af   :  { %v501_v9 = vmul.f32 %v1121_v8, %v1117_v63  ;;  %v1112_v63 = vld [vmem:[#allocation14] sm:$0xff]  }
 0x3b1   :  { %v503_v10 = vpack.c.bf16 %v501_v9, %v501_v9 }
 0x3b2   :  { %v1123_v11 = vpop.eup %1122 }
 0x3b3   :  { %v502_v12 = vmul.f32 %v1123_v11, %v1119_v2  ;;  %1046 = vmatmul.mubr.msk.bf16.vlgmr.msra.gmra.mrb[8].mxu1 %vm480_vm3, %v503_v10  ;;  %v1114_v2 = vld [vmem:[#allocation14 + $0x10] sm:$0xff]  }
 0x3b4   :  { %1059 = vmatprep.mubr.msk.bf16.mxu1 %vm1409_vm0, %v1408_v0  ;;  %1056 = vmatpush3.bf16.msra.mxu1 %v1108_v14 }
 0x3b5   :  { %v504_v13 = vpack.c.bf16 %v502_v12, %v502_v12  ;;  %1057 = vmatprep.subr.bf16.mxu1 %v1408_v0 }
 0x3b7   :  { %1052 = vmatmul.mubr.msk.bf16.vlgmr.msra.gmra.mrb[12].mxu0 %vm480_vm3, %v504_v13 }
 0x3b8   :  { %1067 = vmatprep.mubr.msk.bf16.mxu0 %vm1409_vm0, %v1408_v0  ;;  %1058 = vmatpush3.bf16.msra.mxu1 %v1109_v15 }
 0x3b9   :  { %1071 = vmatprep.subr.bf16.mxu1 %v1408_v0  ;;  %1064 = vmatpush3.bf16.msra.mxu0 %v1110_v45 }
 0x3ba   :  { %1065 = vmatprep.subr.bf16.mxu0 %v1408_v0 }
 0x486   :  { %v546_v16 = vpop.f32.mrb[8].mxu1 }
 0x487   :  { %v1047_v17 = vpop.f32.mrb[9].mxu1 }
 0x488   :  { %v549_v18 = vpop.f32.mrb[10].mxu1 }
 0x489   :  { %v1048_v19 = vpop.f32.mrb[11].mxu1 }
 0x48a   :  { %v592_v20 = vpop.f32.mrb[12].mxu0 }
 0x48b   :  { %v598_v21 = vpack.c.bf16 %v592_v20, %v546_v16  ;;  %v1053_v22 = vpop.f32.mrb[13].mxu0 }
 0x48c   :  { %v595_v23 = vpop.f32.mrb[14].mxu0 }
 0x48d   :  { %v1054_v24 = vpop.f32.mrb[15].mxu0  ;;  %1060 = vmatmul.mubr.msk.bf16.vlgmr.msra.gmra.mrb[12].mxu1 %vm195_vm1, %v598_v21 }
 0x48e   :  { %1079 = vmatprep.mubr.msk.bf16.mxu1 %vm1409_vm0, %v1408_v0  ;;  %1072 = vmatpush3.bf16.msra.mxu1 %v1112_v63 }
 0x48f   :  { %1073 = vmatprep.subr.bf16.mxu1 %v1408_v0 }
 0x492   :  { %1074 = vmatpush3.bf16.msra.mxu1 %v1113_v1 }
 0x493   :  { %1075 = vmatprep.subr.bf16.mxu1 %v1408_v0 }
 0x496   :  { %1076 = vmatpush3.bf16.msra.mxu1 %v1114_v2 }
 0x497   :  { %1077 = vmatprep.subr.bf16.mxu1 %v1408_v0 }
 0x49a   :  { %1078 = vmatpush3.bf16.msra.mxu1 %v1115_v3 }
 0x560   :  { %v657_v26 = vpop.f32.mrb[12].mxu1 }
 0x561   :  { %v658_v27 = vadd.f32 %v961_v25, %v657_v26  ;;  %v1061_v28 = vpop.f32.mrb[13].mxu1 }
 0x562   :  { %v660_v29 = vpop.f32.mrb[14].mxu1 }
 0x563   :  { %v661_v30 = vadd.f32 %v961_v25, %v660_v29  ;;  %v1062_v31 = vpop.f32.mrb[15].mxu1  ;;  %v664_v32 = vadd.f32 %v658_v27, %v1620_v4 }
 0x564   :  { %v971_v31 = vld [vmem:[#allocation16 + $0x4] ss:$0 sm:$0xff] }
 0x565   :  { %v668_v33 = vsel %vm195_vm1, %v664_v32, 0.0  ;;  %v665_v34 = vadd.f32 %v661_v30, %v1622_v5  ;;  %v1111_v5 = vld [vmem:[#allocation13 + $0x8] sm:$0xff]  }
 0x566   :  { %669 = vadd.xlane.f32.xlu0 %v668_v33  ;;  %1066 = vmatpush3.bf16.msra.mxu0 %v1111_v5 }
 0x567   :  { %v671_v35 = vsel %vm195_vm1, %v665_v34, 0.0 }
 0x568   :  { %672 = vadd.xlane.f32.xlu1 %v671_v35 }
 0x5f3   :  { %v670_v36 = vpop.xlane.xlu0 %669 }
 0x5f4   :  { %v675_v37 = vmul.f32 0.03125, %v670_v36 }
 0x5f5   :  { %v673_v38 = vpop.xlane.xlu1 %672 }
 0x5f6   :  { %v677_v39 = vsub.f32 %v664_v32, %v675_v37  ;;  %v676_v40 = vmul.f32 0.03125, %v673_v38 }
 0x5f8   :  { %v678_v41 = vsub.f32 %v665_v34, %v676_v40  ;;  %v679_v42 = vmul.f32 %v677_v39, %v677_v39 }
 0x5fa   :  { %v681_v43 = vsel %vm195_vm1, %v679_v42, 0.0  ;;  %v680_v44 = vmul.f32 %v678_v41, %v678_v41 }
 0x5fb   :  { %682 = vadd.xlane.f32.xlu0 %v681_v43 }
 0x5fc   :  { %v684_v4 = vsel %vm195_vm1, %v680_v44, 0.0 }
 0x5fd   :  { %685 = vadd.xlane.f32.xlu1 %v684_v4 }
 0x688   :  { %v683_v46 = vpop.xlane.xlu0 %682 }
 0x689   :  { %v687_v47 = vmul.f32 0.03125, %v683_v46 }
 0x68a   :  { %v686_v48 = vpop.xlane.xlu1 %685 }
 0x68b   :  { %v689_v49 = vadd.f32 1e-05, %v687_v47  ;;  %v688_v50 = vmul.f32 0.03125, %v686_v48 }
 0x68d   :  { %1124 = vrsqrt.f32 %v689_v49  ;;  %v690_v51 = vadd.f32 1e-05, %v688_v50 }
 0x68f   :  { %1126 = vrsqrt.f32 %v690_v51 }
 0x697   :  { %v1125_v52 = vpop.eup %1124 }
 0x698   :  { %v693_v54 = vmul.f32 %v1125_v52, %v677_v39 }
 0x699   :  { %v1127_v55 = vpop.eup %1126 }
 0x69a   :  { %v699_v56 = vmul.f32 %v965_v53, %v693_v54  ;;  %v694_v57 = vmul.f32 %v1127_v55, %v678_v41 }
 0x69c   :  { %v700_v59 = vmul.f32 %v965_v53, %v694_v57  ;;  %v705_v60 = vadd.f32 %v966_v58, %v699_v56  ;;  %v977_v57 = vld [vmem:[#allocation16 + $0x7] ss:$0 sm:$0xff] }
 0x69e   :  { %v706_v61 = vadd.f32 %v966_v58, %v700_v59 }
 0x6a0   :  { %v707_v62 = vpack.c.bf16 %v706_v61, %v705_v60 }
 0x6a2   :  { %1068 = vmatmul.mubr.msk.bf16.vlgmr.msra.gmra.mrb[16].mxu0 %vm195_vm1, %v707_v62 }
 0x775   :  { %v768_v7 = vpop.f32.mrb[16].mxu0 }
 0x776   :  { %v769_v8 = vadd.f32 %v967_v6, %v768_v7  ;;  %v1069_v9 = vpop.f32.mrb[17].mxu0 }
 0x777   :  { %v771_v10 = vpop.f32.mrb[18].mxu0 }
 0x778   :  { %v775_v11 = vmul.f32 %v769_v8, %v769_v8  ;;  %v772_v12 = vadd.f32 %v967_v6, %v771_v10  ;;  %v1070_v13 = vpop.f32.mrb[19].mxu0 }
 0x77a   :  { %v777_v14 = vmul.f32 %v775_v11, %v769_v8  ;;  %v776_v15 = vmul.f32 %v772_v12, %v772_v12 }
 0x77c   :  { %v779_v16 = vmul.f32 0.044715, %v777_v14  ;;  %v778_v17 = vmul.f32 %v776_v15, %v772_v12 }
 0x77e   :  { %v781_v18 = vadd.f32 %v779_v16, %v769_v8  ;;  %v780_v19 = vmul.f32 0.044715, %v778_v17 }
 0x780   :  { %v783_v20 = vmul.f32 0.7978846, %v781_v18  ;;  %v782_v21 = vadd.f32 %v780_v19, %v772_v12 }
 0x782   :  { %1128 = vtanh.f32 %v783_v20  ;;  %v784_v0 = vmul.f32 0.7978846, %v782_v21 }
 0x784   :  { %1130 = vtanh.f32 %v784_v0 }
 0x78c   :  { %v1129_v22 = vpop.eup %1128 }
 0x78d   :  { %v787_v23 = vadd.f32 1.0, %v1129_v22 }
 0x78e   :  { %v1131_v24 = vpop.eup %1130 }
 0x78f   :  { %v789_v25 = vmul.f32 0.5, %v787_v23  ;;  %v788_v26 = vadd.f32 1.0, %v1131_v24 }
 0x791   :  { %v790_v27 = vmul.f32 0.5, %v788_v26  ;;  %v791_v28 = vmul.f32 %v789_v25, %v769_v8 }
 0x793   :  { %v792_v29 = vmul.f32 %v790_v27, %v772_v12 }
 0x795   :  { %v793_v30 = vpack.c.bf16 %v792_v29, %v791_v28 }
 0x797   :  { %1080 = vmatmul.mubr.msk.bf16.vlgmr.msra.gmra.mrb[16].mxu1 %vm831_vm4, %v793_v30 }
 0x86a   :  { %v869_v32 = vpop.f32.mrb[16].mxu1 }
 0x86b   :  { %v870_v33 = vadd.f32 %v971_v31, %v869_v32  ;;  %v1081_v34 = vpop.f32.mrb[17].mxu1 }
 0x86c   :  { %v872_v35 = vpop.f32.mrb[18].mxu1 }
 0x86d   :  { %v873_v36 = vadd.f32 %v971_v31, %v872_v35  ;;  %v1082_v37 = vpop.f32.mrb[19].mxu1  ;;  %v876_v38 = vadd.f32 %v870_v33, %v705_v60  ;;  %v978_v60 = vld [vmem:[#allocation16 + $0x8] ss:$0 sm:$0xff] }
 0x86f   :  { %v880_v39 = vsel %vm195_vm1, %v876_v38, 0.0  ;;  %v877_v40 = vadd.f32 %v873_v36, %v706_v61 }
 0x870   :  { %881 = vadd.xlane.f32.xlu0 %v880_v39 }
 0x871   :  { %v883_v41 = vsel %vm195_vm1, %v877_v40, 0.0 }
 0x872   :  { %884 = vadd.xlane.f32.xlu1 %v883_v41 }
 0x8fd   :  { %v882_v42 = vpop.xlane.xlu0 %881 }
 0x8fe   :  { %v886_v43 = vmul.f32 0.03125, %v882_v42 }
 0x8ff   :  { %v885_v44 = vpop.xlane.xlu1 %884 }
 0x900   :  { %v888_v4 = vsub.f32 %v876_v38, %v886_v43  ;;  %v887_v45 = vmul.f32 0.03125, %v885_v44 }
 0x902   :  { %v889_v5 = vsub.f32 %v877_v40, %v887_v45  ;;  %v890_v46 = vmul.f32 %v888_v4, %v888_v4 }
 0x904   :  { %v892_v47 = vsel %vm195_vm1, %v890_v46, 0.0  ;;  %v891_v48 = vmul.f32 %v889_v5, %v889_v5 }
 0x905   :  { %893 = vadd.xlane.f32.xlu0 %v892_v47 }
 0x906   :  { %v895_v49 = vsel %vm195_vm1, %v891_v48, 0.0 }
 0x907   :  { %896 = vadd.xlane.f32.xlu1 %v895_v49 }
 0x992   :  { %v894_v50 = vpop.xlane.xlu0 %893 }
 0x993   :  { %v898_v51 = vmul.f32 0.03125, %v894_v50 }
 0x994   :  { %v897_v52 = vpop.xlane.xlu1 %896 }
 0x995   :  { %v900_v53 = vadd.f32 1e-05, %v898_v51  ;;  %v899_v54 = vmul.f32 0.03125, %v897_v52 }
 0x997   :  { %1132 = vrsqrt.f32 %v900_v53  ;;  %v901_v55 = vadd.f32 1e-05, %v899_v54 }
 0x999   :  { %1134 = vrsqrt.f32 %v901_v55 }
 0x9a1   :  { %v1133_v56 = vpop.eup %1132 }
 0x9a2   :  { %v904_v58 = vmul.f32 %v1133_v56, %v888_v4 }
 0x9a3   :  { %v1135_v59 = vpop.eup %1134 }
 0x9a4   :  { %v905_v61 = vmul.f32 %v1135_v59, %v889_v5  ;;  %v910_v62 = vmul.f32 %v977_v57, %v904_v58 }
 0x9a6   :  { %v911_v63 = vmul.f32 %v977_v57, %v905_v61  ;;  %v916_v1 = vadd.f32 %v978_v60, %v910_v62 }
 0x9a8   :  { %v917_v2 = vadd.f32 %v978_v60, %v911_v63  ;;  %919 = vst.msk [vmem:[#allocation19] sm:$0x1] %vm918_vm5, %v916_v1 }
 0x9aa   :  { %920 = vst.msk [vmem:[#allocation19 + $0x1] sm:$0x1] %vm918_vm5, %v917_v2 }
 0x9ab   :  { %1367 = shalt.err (!%p1364_p0)
}
 0x9ac   :  { %s1368_s20 = scalar_lea.hbm %s1707_s10, 32 }
 0x9ad   :  { %p1369_p1 = scmp.ne.s32.totalorder %s1707_s10, %s1368_s20  ;;  %p1372_p2 = scmp.lt.u32.totalorder %s1368_s20, %s1707_s10 }
 0x9af   :  { %p1374_p3 = pnand %p1372_p2, %p1369_p1 }
 0x9b1   :  { %1377 = shalt.err (!%p1374_p3)
}
 0x9b2   :  { %932 = dma.vmem_to_hbm [thread:$0]  %s927_s12, 32, %s1707_s10, [#allocation4], %s1393_s23, %s1393_s23, %s1394_s24  }
 0x9b3   :  { %1390 = dma.done.wait [#allocation4], 32  }
 0x9b4   :  { %1391 = vsyncadd [#allocation4], 4294967264 }
 0x9b5   :  { %936 = vsyncpa [#allocation3], 1 }
 0x9b6   :  { %937 = vsyncpa [#allocation6], 1 }
 0x9b7   :  { %938 = vsyncpa [#allocation9], 1 }
 0x9b8   :  { %939 = vsyncpa [#allocation12], 1 }
 0x9b9   :  { %940 = vsyncpa [#allocation15], 1 }
 0x9ba   :  { %941 = vsyncpa [#allocation18], 1 }
 0x9bb   :  { %942 = vsyncpa [#allocation4], 1 }

</bundles_post_ra>
